<compile_context>
chip_gen: v7x
topology: tpu7x:2x2x1
jax: 0.10.0
libtpu: 0.0.40
codegen_flags: <defaults>
</compile_context>

<pallas_src>
import functools

import jax
import jax.numpy as jnp
from jax.experimental import pallas as pl
from jax.experimental.pallas import tpu as pltpu


def compute_total_polynomial_terms(latent_dim, poly_degree):
    return sum(latent_dim ** d for d in range(poly_degree + 1))


def _round_up(x, m):
    return ((x + m - 1) // m) * m


def _poly_decoder_kernel(z_ref, w_ref, b_ref, o_ref, *, poly_degree, k_pad):
    """z_ref: (TB, L)  w_ref: (Kp, Ds)  b_ref: (1, Ds)  o_ref: (TB, Ds).

    b_ref already contains bias + degree-0 weight row, so only degree >= 1
    features are materialized here. w_ref rows beyond P-1 are zero padding.
    """
    z = z_ref[...].astype(jnp.float32)                       # (TB, L)
    TB, L = z.shape

    # Degree-1..poly_degree Kronecker powers. The growing dimension stays on
    # the lane axis (z broadcast across sublanes) so vregs stay dense and the
    # per-degree reshape is cheap. Ordering is identical to torch.kron
    # chaining because kron is associative and all factors are the same z.
    feats = []
    cur = z                                                  # degree-1, (TB, L)
    for d in range(1, poly_degree + 1):
        feats.append(cur)
        if d < poly_degree:
            cur = (z[:, :, None] * cur[:, None, :]).reshape(TB, L * cur.shape[1])
    if k_pad:
        feats.append(jnp.zeros((TB, k_pad), jnp.float32))    # align K to 8
    phi = feats[0] if len(feats) == 1 else jnp.concatenate(feats, axis=-1)

    # TODO(synk): profile-gated alternatives -- per-degree jnp.dot accumulation
    # (skips the lane concatenate), and bf16 matmul operands on v5e with f32
    # accumulation if the accuracy budget allows.
    out = b_ref[...] + jnp.dot(
        phi, w_ref[...].astype(jnp.float32),
        preferred_element_type=jnp.float32,
    )
    o_ref[...] = out.astype(o_ref.dtype)


def poly_decoder_pallas(z, W, b, poly_degree, *, block_b=256):
    """PolyDecoder forward.

    z: (B, L) f32 latents.
    W: (data_dim, total_poly_terms) f32  -- nn.Linear weight.
    b: (data_dim,) f32                   -- nn.Linear bias.
    Returns (B, data_dim).
    """
    assert poly_degree >= 1, "poly_degree == 0 degenerates to bias + W[:, 0]"
    B, L = z.shape
    D, P = W.shape
    assert P == compute_total_polynomial_terms(L, poly_degree)

    # ---- host-side layout prep --------------------------------------------
    # Lane-dense output only when data_dim is large; tiny D stays unpadded so
    # we don't write 16x the useful bytes to HBM (matters most on v5e).
    Ds = _round_up(D, 128) if D >= 128 else D
    # Contraction axis padded to a multiple of 8 -> unmasked W sublane loads
    # and a full final MXU K pass.
    K = P - 1
    Kp = _round_up(K, 8)

    w_t = W.T.astype(jnp.float32)                              # (P, D)
    w_t = jnp.pad(w_t, ((0, 0), (0, Ds - D)))                  # (P, Ds)
    # Fold the degree-0 (constant '1') weight row into the bias.
    b_row = (jnp.pad(b.astype(jnp.float32), (0, Ds - D)) + w_t[0, :]).reshape(1, Ds)
    w_rest = jnp.pad(w_t[1:, :], ((0, Kp - K), (0, 0)))        # (Kp, Ds)

    # ---- batch tiling -------------------------------------------------------
    B8 = _round_up(B, 8)
    TB = min(block_b, B8)
    if B8 > 8 and pl.cdiv(B8, TB) < 2:
        # Guarantee >= 2 grid steps so the "parallel" axis actually shards
        # across both TensorCores on v7x instead of collapsing to one step.
        TB = max(8, _round_up(pl.cdiv(B8, 2), 8))
    Bp = pl.cdiv(B, TB) * TB
    z_pad = jnp.pad(z, ((0, Bp - B), (0, 0)))                  # zero rows sliced off
    grid = (Bp // TB,)

    # ---- VMEM budget (computed, capped below v7x's 64 MiB per-TC VMEM) ------
    need_bytes = 4 * (
        2 * TB * L          # z tiles (double-buffered)
        + 2 * TB * Ds       # out tiles (double-buffered)
        + 2 * Kp * Ds       # W (worst case: double-buffered fallback)
        + 2 * Ds            # fused bias
        + 3 * TB * Kp       # phi + kron intermediates (generous)
    )
    vmem_limit = int(min(48 * 2**20, max(2 * need_bytes, 16 * 2**20)))

    # ---- cost hint for the surrounding XLA graph ----------------------------
    kron_mults = B * sum(L ** d for d in range(2, poly_degree + 1))
    cost = pl.CostEstimate(
        flops=2 * B * Kp * Ds + 2 * kron_mults,
        transcendentals=0,
        bytes_accessed=4 * (z_pad.size + w_rest.size + b_row.size + Bp * Ds),
    )

    kernel = functools.partial(
        _poly_decoder_kernel, poly_degree=poly_degree, k_pad=Kp - K)

    def call(single_buffer_weights):
        if single_buffer_weights:
            # W / bias never change across grid steps: a single VMEM buffer
            # halves their resident footprint vs. the default double-buffer.
            w_spec = pl.BlockSpec((Kp, Ds), lambda i: (0, 0),
                                  pipeline_mode=pl.Buffered(1))
            b_spec = pl.BlockSpec((1, Ds), lambda i: (0, 0),
                                  pipeline_mode=pl.Buffered(1))
        else:
            w_spec = pl.BlockSpec((Kp, Ds), lambda i: (0, 0))
            b_spec = pl.BlockSpec((1, Ds), lambda i: (0, 0))
        return pl.pallas_call(
            kernel,
            out_shape=jax.ShapeDtypeStruct((Bp, Ds), z.dtype),
            grid=grid,
            in_specs=[
                pl.BlockSpec((TB, L), lambda i: (i, 0)),   # z tile per step
                w_spec,                                    # W resident
                b_spec,                                    # fused bias resident
            ],
            out_specs=pl.BlockSpec((TB, Ds), lambda i: (i, 0)),
            compiler_params=pltpu.CompilerParams(
                dimension_semantics=("parallel",),
                vmem_limit_bytes=vmem_limit,
            ),
            cost_estimate=cost,
        )(z_pad, w_rest, b_row)

    try:
        out = call(True)
    except Exception:  # pragma: no cover - JAX build without pipeline_mode support
        out = call(False)

    # TODO(synk): for production sizes where Kp*Ds*4 reaches tens of MB, add a
    # second "parallel" grid axis over data_dim with W BlockSpec
    # ((Kp, TN), lambda i, j: (0, j)) and recompute phi per N-tile so W never
    # needs full VMEM residency (v7x 64 MiB per-TC budget).
    out = out[:B]
    if Ds != D:
        out = out[:, :D]
    return out


def poly_decoder_reference(z, W, b, poly_degree):
    """Pure-JAX reference mirroring the PyTorch loop semantics exactly."""
    B, L = z.shape
    feats = [jnp.ones((B, 1), z.dtype)]
    cur = z
    for d in range(1, poly_degree + 1):
        feats.append(cur)
        if d < poly_degree:
            cur = (cur[:, :, None] * z[:, None, :]).reshape(B, -1)
    phi = jnp.concatenate(feats, axis=-1)        # (B, total_poly_terms)
    return phi @ W.T + b


if __name__ == "__main__":
    # Small shapes consistent with the module's forward pass.
    latent_dim = 4
    poly_degree = 3
    data_dim = 8
    batch = 16
    total_poly_terms = compute_total_polynomial_terms(latent_dim, poly_degree)  # 85

    key = jax.random.PRNGKey(0)
    kz, kw, kb = jax.random.split(key, 3)

    # Deterministic synthetic nn.Linear(total_poly_terms, data_dim) parameters.
    bound = 1.0 / (total_poly_terms ** 0.5)
    W = jax.random.uniform(kw, (data_dim, total_poly_terms),
                           minval=-bound, maxval=bound, dtype=jnp.float32)
    b = jax.random.uniform(kb, (data_dim,),
                           minval=-bound, maxval=bound, dtype=jnp.float32)
    z = jax.random.normal(kz, (batch, latent_dim), dtype=jnp.float32)

    # batch=16 -> TB shrinks to 8 via the >=2-step heuristic, exercising the
    # batch grid, K padding (84 -> 88) and the unpadded small-D output path.
    out = poly_decoder_pallas(z, W, b, poly_degree)
    out = jax.block_until_ready(out)

    ref = poly_decoder_reference(z, W, b, poly_degree)
    assert out.shape == (batch, data_dim)
    assert jnp.allclose(out, ref, atol=1e-4, rtol=1e-5), "mismatch vs reference"

    print("KERNEL_OK")
</pallas_src>

<mosaic_0001>
module attributes {stable_mosaic.version = 11 : i64} {
  func.func @_poly_decoder_kernel(%arg0: i32, %arg1: memref<8x4xf32, #tpu.memory_space<vmem>>, %arg2: memref<88x8xf32, #tpu.memory_space<vmem>>, %arg3: memref<1x8xf32, #tpu.memory_space<vmem>>, %arg4: memref<8x8xf32, #tpu.memory_space<vmem>>) attributes {dimension_semantics = [#tpu.dimension_semantics<parallel>], iteration_bounds = array<i64: 2>, scalar_prefetch = 0 : i64, scratch_operands = 0 : i64, tpu.core_type = #tpu.core_type<tc>, window_params = [{transform_indices = @transform_0, window_bounds = array<i64: 8, 4>}, {pipeline_mode = #tpu.pipeline_mode<synchronous>, transform_indices = @transform_1, window_bounds = array<i64: 88, 8>}, {pipeline_mode = #tpu.pipeline_mode<synchronous>, transform_indices = @transform_2, window_bounds = array<i64: 1, 8>}, {transform_indices = @transform_3, window_bounds = array<i64: 8, 8>}]} {
    %c0 = arith.constant 0 : index
    %c0_0 = arith.constant 0 : index
    %0 = vector.load %arg1[%c0, %c0_0] : memref<8x4xf32, #tpu.memory_space<vmem>>, vector<8x4xf32>
    %1 = vector.shape_cast %0 : vector<8x4xf32> to vector<8x4x1xf32>
    %2 = vector.shape_cast %0 : vector<8x4xf32> to vector<8x1x4xf32>
    %3 = vector.broadcast %1 : vector<8x4x1xf32> to vector<8x4x4xf32>
    %4 = vector.broadcast %2 : vector<8x1x4xf32> to vector<8x4x4xf32>
    %5 = arith.mulf %3, %4 : vector<8x4x4xf32>
    %6 = vector.shape_cast %5 : vector<8x4x4xf32> to vector<8x16xf32>
    %7 = vector.shape_cast %0 : vector<8x4xf32> to vector<8x4x1xf32>
    %8 = vector.shape_cast %6 : vector<8x16xf32> to vector<8x1x16xf32>
    %9 = vector.broadcast %7 : vector<8x4x1xf32> to vector<8x4x16xf32>
    %10 = vector.broadcast %8 : vector<8x1x16xf32> to vector<8x4x16xf32>
    %11 = arith.mulf %9, %10 : vector<8x4x16xf32>
    %12 = vector.shape_cast %11 : vector<8x4x16xf32> to vector<8x64xf32>
    %cst = arith.constant 0.000000e+00 : f32
    %13 = vector.broadcast %cst : f32 to vector<8x4xf32>
    %14 = tpu.concatenate %0, %6, %12, %13 in 1 : vector<8x4xf32>, vector<8x16xf32>, vector<8x64xf32>, vector<8x4xf32> -> vector<8x88xf32>
    %c0_1 = arith.constant 0 : index
    %c0_2 = arith.constant 0 : index
    %15 = vector.load %arg3[%c0_1, %c0_2] : memref<1x8xf32, #tpu.memory_space<vmem>>, vector<1x8xf32>
    %c0_3 = arith.constant 0 : index
    %c0_4 = arith.constant 0 : index
    %16 = vector.load %arg2[%c0_3, %c0_4] : memref<88x8xf32, #tpu.memory_space<vmem>>, vector<88x8xf32>
    %cst_5 = arith.constant dense<0.000000e+00> : vector<8x8xf32>
    %17 = tpu.matmul %14, %16, %cst_5 {dimension_numbers = #tpu.dot_dimension_numbers<[1], [0], [0], [1], [0, 0, 1, 1], [], []>} : vector<8x88xf32>, vector<88x8xf32>, vector<8x8xf32> -> vector<8x8xf32>
    %18 = vector.broadcast %15 : vector<1x8xf32> to vector<8x8xf32>
    %19 = arith.addf %18, %17 : vector<8x8xf32>
    %c0_6 = arith.constant 0 : index
    %c0_7 = arith.constant 0 : index
    %20 = vector.load %arg4[%c0_6, %c0_7] : memref<8x8xf32, #tpu.memory_space<vmem>>, vector<8x8xf32>
    tpu.vector_store %arg4[%c0_6, %c0_7], %19 {strides = array<i32>} : memref<8x8xf32, #tpu.memory_space<vmem>>, vector<8x8xf32>,
    return
  }
  func.func @transform_0(%arg0: i32) -> (i32, i32) {
    %c0_i32 = arith.constant 0 : i32
    %c0_i32_0 = arith.constant 0 : i32
    return %arg0, %c0_i32 : i32, i32
  }
  func.func @transform_1(%arg0: i32) -> (i32, i32) {
    %c0_i32 = arith.constant 0 : i32
    %c0_i32_0 = arith.constant 0 : i32
    %c0_i32_1 = arith.constant 0 : i32
    return %c0_i32, %c0_i32_0 : i32, i32
  }
  func.func @transform_2(%arg0: i32) -> (i32, i32) {
    %c0_i32 = arith.constant 0 : i32
    %c0_i32_0 = arith.constant 0 : i32
    %c0_i32_1 = arith.constant 0 : i32
    return %c0_i32, %c0_i32_0 : i32, i32
  }
  func.func @transform_3(%arg0: i32) -> (i32, i32) {
    %c0_i32 = arith.constant 0 : i32
    %c0_i32_0 = arith.constant 0 : i32
    return %arg0, %c0_i32 : i32, i32
  }
}

module attributes {stable_mosaic.version = 11 : i64} {
  func.func @_poly_decoder_kernel(%arg0: i32, %arg1: memref<8x4xf32, #tpu.memory_space<vmem>>, %arg2: memref<88x8xf32, #tpu.memory_space<vmem>>, %arg3: memref<1x8xf32, #tpu.memory_space<vmem>>, %arg4: memref<8x8xf32, #tpu.memory_space<vmem>>) attributes {dimension_semantics = [#tpu.dimension_semantics<parallel>], iteration_bounds = array<i64: 2>, scalar_prefetch = 0 : i64, scratch_operands = 0 : i64, tpu.core_type = #tpu.core_type<tc>, window_params = [{transform_indices = @transform_0, window_bounds = array<i64: 8, 4>}, {pipeline_mode = #tpu.pipeline_mode<synchronous>, transform_indices = @transform_1, window_bounds = array<i64: 88, 8>}, {pipeline_mode = #tpu.pipeline_mode<synchronous>, transform_indices = @transform_2, window_bounds = array<i64: 1, 8>}, {transform_indices = @transform_3, window_bounds = array<i64: 8, 8>}]} {
    %c0 = arith.constant 0 : index
    %c0_0 = arith.constant 0 : index
    %0 = vector.load %arg1[%c0, %c0_0] : memref<8x4xf32, #tpu.memory_space<vmem>>, vector<8x4xf32>
    %1 = vector.shape_cast %0 : vector<8x4xf32> to vector<8x4x1xf32>
    %2 = vector.shape_cast %0 : vector<8x4xf32> to vector<8x1x4xf32>
    %3 = vector.broadcast %1 : vector<8x4x1xf32> to vector<8x4x4xf32>
    %4 = vector.broadcast %2 : vector<8x1x4xf32> to vector<8x4x4xf32>
    %5 = arith.mulf %3, %4 : vector<8x4x4xf32>
    %6 = vector.shape_cast %5 : vector<8x4x4xf32> to vector<8x16xf32>
    %7 = vector.shape_cast %0 : vector<8x4xf32> to vector<8x4x1xf32>
    %8 = vector.shape_cast %6 : vector<8x16xf32> to vector<8x1x16xf32>
    %9 = vector.broadcast %7 : vector<8x4x1xf32> to vector<8x4x16xf32>
    %10 = vector.broadcast %8 : vector<8x1x16xf32> to vector<8x4x16xf32>
    %11 = arith.mulf %9, %10 : vector<8x4x16xf32>
    %12 = vector.shape_cast %11 : vector<8x4x16xf32> to vector<8x64xf32>
    %cst = arith.constant 0.000000e+00 : f32
    %13 = vector.broadcast %cst : f32 to vector<8x4xf32>
    %14 = tpu.concatenate %0, %6, %12, %13 in 1 : vector<8x4xf32>, vector<8x16xf32>, vector<8x64xf32>, vector<8x4xf32> -> vector<8x88xf32>
    %c0_1 = arith.constant 0 : index
    %c0_2 = arith.constant 0 : index
    %15 = vector.load %arg3[%c0_1, %c0_2] : memref<1x8xf32, #tpu.memory_space<vmem>>, vector<1x8xf32>
    %c0_3 = arith.constant 0 : index
    %c0_4 = arith.constant 0 : index
    %16 = vector.load %arg2[%c0_3, %c0_4] : memref<88x8xf32, #tpu.memory_space<vmem>>, vector<88x8xf32>
    %cst_5 = arith.constant dense<0.000000e+00> : vector<8x8xf32>
    %17 = tpu.matmul %14, %16, %cst_5 {dimension_numbers = #tpu.dot_dimension_numbers<[1], [0], [0], [1], [0, 0, 1, 1], [], []>} : vector<8x88xf32>, vector<88x8xf32>, vector<8x8xf32> -> vector<8x8xf32>
    %18 = vector.broadcast %15 : vector<1x8xf32> to vector<8x8xf32>
    %19 = arith.addf %18, %17 : vector<8x8xf32>
    %c0_6 = arith.constant 0 : index
    %c0_7 = arith.constant 0 : index
    %20 = vector.load %arg4[%c0_6, %c0_7] : memref<8x8xf32, #tpu.memory_space<vmem>>, vector<8x8xf32>
    tpu.vector_store %arg4[%c0_6, %c0_7], %19 {strides = array<i32>} : memref<8x8xf32, #tpu.memory_space<vmem>>, vector<8x8xf32>,
    return
  }
  func.func @transform_0(%arg0: i32) -> (i32, i32) {
    %c0_i32 = arith.constant 0 : i32
    %c0_i32_0 = arith.constant 0 : i32
    return %arg0, %c0_i32 : i32, i32
  }
  func.func @transform_1(%arg0: i32) -> (i32, i32) {
    %c0_i32 = arith.constant 0 : i32
    %c0_i32_0 = arith.constant 0 : i32
    %c0_i32_1 = arith.constant 0 : i32
    return %c0_i32, %c0_i32_0 : i32, i32
  }
  func.func @transform_2(%arg0: i32) -> (i32, i32) {
    %c0_i32 = arith.constant 0 : i32
    %c0_i32_0 = arith.constant 0 : i32
    %c0_i32_1 = arith.constant 0 : i32
    return %c0_i32, %c0_i32_0 : i32, i32
  }
  func.func @transform_3(%arg0: i32) -> (i32, i32) {
    %c0_i32 = arith.constant 0 : i32
    %c0_i32_0 = arith.constant 0 : i32
    return %arg0, %c0_i32 : i32, i32
  }
}

</mosaic_0001>

<bundles_post_ra>
// kernel: tpu_custom_call.1
= control target key start
LH: loop header
LB: loop body
LE: loop exit
PB: predicated region body
PF: predicated region fallthrough
CT: control target
= control target key end

     0   :  { %s1131_s12 = smov 0   ;;  %s1429_s0 = inlined_call_operand.vmem [shape: f32[16,4], index: 0, kind: input, shape index: {}]   ;;  %s1430_s1 = inlined_call_operand.vmem [shape: f32[88,8], index: 1, kind: input, shape index: {}]   ;;  %s1431_s2 = inlined_call_operand.vmem [shape: f32[1,8], index: 2, kind: input, shape index: {}]   ;;  %s1432_s3 = inlined_call_operand.vmem [shape: f32[16,8], index: 3, kind: output, shape index: {}]  }
   0x1 LB: > { %s1005_s13 = sadd.s32 4294967295, %s1096_s12   ;;  %p1009_p0 = scmp.ge.s32.totalorder %s1096_s12, 1  ;;  %s1096_s12 = sphi %s1131_s12, %s13_s12  }
   0x2   : > { %p136_p1 = scmp.lt.s32.totalorder %s1096_s12, 3 }
   0x4   : > { %p137_p2 = pnand %p1009_p0, %p136_p1 }
   0x5   : > { %p158_p3 = scmp.lt.s32.totalorder (!%p137_p2), %s1005_s13, 1  ;;  %v167_v0 = vlaneseq (!%p137_p2)  ;;  %v1098_v19 = vmov (!%p137_p2), 1966171168   ;;  %v1099_v27 = vmov (!%p137_p2), 1983009808   ;;  %s1102_s18 = smov (!%p137_p2), 4  }
   0x6   : > { %140 = sbr.rel (%p137_p2) target bundleno = 774 (0x306), region = 32  ;;  %v226_v20 = vunpack.c.l.s4 (!%p137_p2), %v1098_v19  ;;  %v323_v28 = vunpack.c.l.s4 (!%p137_p2), %v1099_v27  ;;  %v1100_v31 = vmov (!%p137_p2), 1934713408   ;;  %s1103_s19 = smov (!%p137_p2), 8   ;;  %vm401_vm0 = vcmask (!%p137_p2), 31744  }
   0x7   : > { %v168_v1 = vshrl.u32 (!%p137_p2), %v167_v0, 7  ;;  %v356_v32 = vunpack.c.l.s4 (!%p137_p2), %v1100_v31  ;;  %s1104_s20 = smov (!%p137_p2), 12   ;;  %vm403_vm1 = vcmask (!%p137_p2), 64512   ;;  %vm405_vm2 = vcmask (!%p137_p2), 97280   ;;  %s1106_s6 = smov (!%p137_p2), 48  }
   0x8   : > { %v227_v21 = vunpack.c.0.s8 (!%p137_p2), %v226_v20  ;;  %v324_v34 = vunpack.c.0.s8 (!%p137_p2), %v323_v28  ;;  %s1107_s7 = smov (!%p137_p2), 16   ;;  %s1108_s15 = smov (!%p137_p2), 32   ;;  %vm1109_vm3 = vmmov (!%p137_p2), 0   ;;  %vm839_vm4 = vcmask (!%p137_p2), 130048  }
   0x9   : > { %v1142_v2 = vsub.s32 (!%p137_p2), 0, %v168_v1  ;;  %v183_v3 = vsub.s32 (!%p137_p2), 2, %v168_v1  ;;  %v190_v4 = vsub.s32 (!%p137_p2), 3, %v168_v1  ;;  %v176_v5 = vsub.s32 (!%p137_p2), 1, %v168_v1 }
   0xa   : > { %v204_v11 = vsub.s32 (!%p137_p2), 5, %v168_v1  ;;  %v197_v12 = vsub.s32 (!%p137_p2), 4, %v168_v1  ;;  %v218_v15 = vsub.s32 (!%p137_p2), 7, %v168_v1  ;;  %v211_v16 = vsub.s32 (!%p137_p2), 6, %v168_v1 }
   0xb   : > { %v230_v22 = vsub.s32 (!%p137_p2), %v227_v21, %v168_v1  ;;  %v357_v38 = vunpack.c.0.s8 (!%p137_p2), %v356_v32  ;;  %v1165_v40 = vsub.s32 (!%p137_p2), %v324_v34, %v168_v1  ;;  %vm841_vm5 = vcmask (!%p137_p2), 261120  }
   0xc   : > { %vm843_vm6 = vcmask (!%p137_p2), 392192   ;;  %vm854_vm7 = vcmask (!%p137_p2), 162816   ;;  %vm856_vm8 = vcmask (!%p137_p2), 687104   ;;  %vm870_vm9 = vcmask (!%p137_p2), 719872  }
   0xd   : > { %s1434_s13 = smov (!%p158_p3, %s1005_s13), 1  ;;  %v1173_v47 = vsub.s32 %v357_v38, %v168_v1 }
   0xe   : > { %s1010_s14 = sshll.u32 %s1434_s13, 3 }
   0xf   : > { %s161_s17 = scalar_lea.vmem %s1429_s0, %s1010_s14  ;;  %s165_s27 = scalar_lea.vmem %s1432_s3, %s1010_s14 }
  0x10   : > { %v1149_v6 = vld [vmem:[%s161_s17] sm:$0xff] }
  0x11   : > { %v184_v7 = vrot.slane %v1149_v6, %v183_v3  ;;  %v170_v8 = vrot.slane %v1149_v6, %v1142_v2  ;;  %v191_v9 = vrot.slane %v1149_v6, %v190_v4  ;;  %v177_v10 = vrot.slane %v1149_v6, %v176_v5 }
  0x12   : > { %v205_v13 = vrot.slane %v1149_v6, %v204_v11  ;;  %v198_v14 = vrot.slane %v1149_v6, %v197_v12  ;;  %v219_v17 = vrot.slane %v1149_v6, %v218_v15  ;;  %v212_v18 = vrot.slane %v1149_v6, %v211_v16 }
  0x13   : > { %186 = vbcast.lane.b32.xlu1 %v184_v7, 256  ;;  %172 = vbcast.lane.b32.xlu0 %v170_v8, 256  ;;  %v231_v23 = vrot.slane %v1149_v6, %v230_v22  ;;  %v224_v25 = vcombine.high %v1149_v6, %v1149_v6  ;;  %v1101_v3 = vmov 0.0  }
  0x14   : > { %1050 = vmatprep.mubr.msk.f32.mxu0 %vm1109_vm3, %v1101_v3 }
  0x15   : > { %v247_v24 = vrot.slane %v231_v23, %v230_v22  ;;  %v239_v26 = vcombine.high %v231_v23, %v231_v23  ;;  %v238_v30 = vrot.slane %v224_v25, %v230_v22 }
  0x17   : > { %193 = vbcast.lane.b32.xlu1 %v191_v9, 256  ;;  %179 = vbcast.lane.b32.xlu0 %v177_v10, 256  ;;  %v269_v29 = vcombine.high %v247_v24, %v247_v24  ;;  %v261_v33 = vrot.slane %v239_v26, %v230_v22  ;;  %v276_v36 = vrot.slane %v247_v24, %v1142_v2 }
  0x18   : > { %v240_v37 = vcombine.high %v238_v30, %v238_v30  ;;  %v254_v46 = vrot.slane %v238_v30, %v230_v22 }
  0x19   : > { %v284_v35 = vrot.slane %v269_v29, %v1142_v2  ;;  %v271_v39 = vcombine.high %v261_v33, %v261_v33  ;;  %v280_v49 = vrot.slane %v261_v33, %v1142_v2 }
  0x1a   : > { %v268_v45 = vrot.slane %v240_v37, %v230_v22  ;;  %v292_v55 = vrot.slane %v254_v46, %v1142_v2  ;;  %v270_v57 = vcombine.high %v254_v46, %v254_v46 }
  0x1b   : > { %207 = vbcast.lane.b32.xlu1 %v205_v13, 256  ;;  %200 = vbcast.lane.b32.xlu0 %v198_v14, 256  ;;  %v288_v48 = vrot.slane %v271_v39, %v1142_v2 }
  0x1c   : > { %v296_v54 = vrot.slane %v268_v45, %v1142_v2  ;;  %v272_v56 = vcombine.high %v268_v45, %v268_v45  ;;  %v300_v8 = vrot.slane %v270_v57, %v1142_v2 }
  0x1e   : > { %v304_v11 = vrot.slane %v272_v56, %v1142_v2 }
  0x1f   : > { %221 = vbcast.lane.b32.xlu1 %v219_v17, 256  ;;  %214 = vbcast.lane.b32.xlu0 %v212_v18, 256 }
  0x85   : > { %v1167_v41 = vpop.permute.xlu1 %186  ;;  %v1169_v42 = vpop.permute.xlu0 %172 }
  0x86   : > { %v315_v43 = vmul.f32 %v284_v35, %v1167_v41  ;;  %v313_v44 = vmul.f32 %v276_v36, %v1169_v42 }
  0x88   : > { %v1178_v50 = vrot.slane %v315_v43, %v1165_v40  ;;  %v413_v51 = vrot.slane %v313_v44, %v1165_v40  ;;  %v321_v9 = vcombine.low %v313_v44, %v315_v43 }
  0x89   : > { %v1181_v52 = vpop.permute.xlu1 %193  ;;  %v1183_v53 = vpop.permute.xlu0 %179 }
  0x8a   : > { %v1189_v58 = vrot.slane %v1178_v50, %v1173_v47  ;;  %v1192_v59 = vrot.slane %v413_v51, %v1173_v47  ;;  %v316_v60 = vmul.f32 %v288_v48, %v1181_v52  ;;  %v314_v61 = vmul.f32 %v280_v49, %v1183_v53 }
  0x8b   : > { %v1235_v24 = vrot.slane %v321_v9, %v1165_v40  ;;  %v414_v39 = vcombine.high %v413_v51, %v1101_v3  ;;  %v462_v49 = vcombine.high %v1178_v50, %v1101_v3 }
  0x8c   : > { %v485_v62 = vrot.slane %v316_v60, %v1165_v40  ;;  %v437_v63 = vrot.slane %v314_v61, %v1165_v40  ;;  %v429_v4 = vcombine.high %v1192_v59, %v1101_v3  ;;  %v329_v10 = vcombine.low %v314_v61, %v316_v60 }
  0x8d   : > { %v1198_v0 = vpop.permute.xlu1 %207  ;;  %v1200_v1 = vpop.permute.xlu0 %200  ;;  %v477_v12 = vcombine.high %v1189_v58, %v1101_v3  ;;  %v428_v51 = vrot.slane %v414_v39, %v1173_v47  ;;  %v476_v56 = vrot.slane %v462_v49, %v1173_v47 }
  0x8e   : > { %v318_v5 = vmul.f32 %v296_v54, %v1198_v0  ;;  %v317_v7 = vmul.f32 %v292_v55, %v1200_v1  ;;  %607 = vrot.lane.b32.xlu0 %v429_v4, %s1102_s18  ;;  %v1212_v13 = vrot.slane %v485_v62, %v1173_v47  ;;  %v1215_v14 = vrot.slane %v437_v63, %v1173_v47 }
  0x8f   : > { %v1227_v20 = vrot.slane %v329_v10, %v1165_v40  ;;  %v438_v54 = vcombine.high %v437_v63, %v1101_v3  ;;  %v486_v57 = vcombine.high %v485_v62, %v1101_v3  ;;  %v478_v10 = vcombine.high %v476_v56, %v1101_v3 }
  0x90   : > { %v533_v15 = vrot.slane %v318_v5, %v1165_v40  ;;  %v509_v16 = vrot.slane %v317_v7, %v1165_v40  ;;  %v453_v23 = vcombine.high %v1215_v14, %v1101_v3  ;;  %v501_v26 = vcombine.high %v1212_v13, %v1101_v3 }
  0x91   : > { %v1219_v17 = vpop.permute.xlu1 %221  ;;  %v1221_v18 = vpop.permute.xlu0 %214  ;;  %v353_v32 = vcombine.low %v1235_v24, %v1227_v20  ;;  %v452_v60 = vrot.slane %v438_v54, %v1173_v47  ;;  %v500_v4 = vrot.slane %v486_v57, %v1173_v47 }
  0x92   : > { %v1224_v19 = vrot.slane %v509_v16, %v1173_v47  ;;  %v320_v21 = vmul.f32 %v304_v11, %v1219_v17  ;;  %v319_v22 = vmul.f32 %v300_v8, %v1221_v18  ;;  %611 = vrot.lane.b32.xlu0 %v477_v12, %s1102_s18  ;;  %v1238_v25 = vrot.slane %v533_v15, %v1173_v47 }
  0x93   : > { %609 = vrot.lane.b32.xlu1 %v453_v23, %s1102_s18  ;;  %v1265_v44 = vrot.slane %v353_v32, %v1173_v47  ;;  %v510_v55 = vcombine.high %v509_v16, %v1101_v3  ;;  %v534_v63 = vcombine.high %v533_v15, %v1101_v3  ;;  %v430_v8 = vcombine.high %v428_v51, %v1101_v3 }
  0x94   : > { %v525_v27 = vcombine.high %v1224_v19, %v1101_v3  ;;  %v345_v28 = vcombine.low %v318_v5, %v320_v21  ;;  %v581_v29 = vrot.slane %v320_v21, %v1165_v40  ;;  %v337_v30 = vcombine.low %v317_v7, %v319_v22 }
  0x95   : > { %v557_v31 = vrot.slane %v319_v22, %v1165_v40  ;;  %v549_v38 = vcombine.high %v1238_v25, %v1101_v3  ;;  %v524_v61 = vrot.slane %v510_v55, %v1173_v47  ;;  %v548_v7 = vrot.slane %v534_v63, %v1173_v47 }
  0x96   : > { %v352_v33 = vrot.slane %v345_v28, %v1165_v40  ;;  %v344_v34 = vrot.slane %v337_v30, %v1165_v40  ;;  %615 = vrot.lane.b32.xlu0 %v525_v27, %s1102_s18  ;;  %v1256_v36 = vrot.slane %v581_v29, %v1173_v47  ;;  %v582_v5 = vcombine.high %v581_v29, %v1101_v3 }
  0x97   : > { %v1253_v35 = vrot.slane %v557_v31, %v1173_v47  ;;  %613 = vrot.lane.b32.xlu1 %v501_v26, %s1102_s18  ;;  %v558_v50 = vcombine.high %v557_v31, %v1101_v3  ;;  %v454_v11 = vcombine.high %v452_v60, %v1101_v3  ;;  %v526_v12 = vcombine.high %v524_v61, %v1101_v3 }
  0x98   : > { %v369_v37 = vcombine.low %v344_v34, %v352_v33  ;;  %v597_v46 = vcombine.high %v1256_v36, %v1101_v3  ;;  %v596_v9 = vrot.slane %v582_v5, %v1173_v47  ;;  %v502_v15 = vcombine.high %v500_v4, %v1101_v3 }
  0x99   : > { %v573_v43 = vcombine.high %v1253_v35, %v1101_v3  ;;  %v572_v62 = vrot.slane %v558_v50, %v1173_v47  ;;  %v370_v21 = vcombine.high %v344_v34, %v352_v33  ;;  %v550_v22 = vcombine.high %v548_v7, %v1101_v3 }
  0x9a   : > { %v1268_v45 = vrot.slane %v369_v37, %v1173_v47  ;;  %v354_v23 = vcombine.high %v1235_v24, %v1227_v20  ;;  %v598_v27 = vcombine.high %v596_v9, %v1101_v3 }
  0x9b   : > { %619 = vrot.lane.b32.xlu0 %v573_v43, %s1102_s18  ;;  %617 = vrot.lane.b32.xlu1 %v549_v38, %s1102_s18  ;;  %v574_v16 = vcombine.high %v572_v62, %v1101_v3  ;;  %v384_v28 = vrot.slane %v370_v21, %v1173_v47 }
  0x9c   : > { %v385_v48 = vcombine.low %v1265_v44, %v1268_v45  ;;  %v386_v26 = vcombine.high %v1265_v44, %v1268_v45  ;;  %v368_v29 = vrot.slane %v354_v23, %v1173_v47  ;;  %v869_v45 = vld [vmem:[%s1430_s1 + $0x50] sm:$0xff] }
  0x9e   : > { %v387_v30 = vcombine.low %v368_v29, %v384_v28  ;;  %v388_v31 = vcombine.high %v368_v29, %v384_v28 }
  0x9f   : > { %639 = vrot.lane.b32.xlu0 %v428_v51, %s1103_s19  ;;  %621 = vrot.lane.b32.xlu1 %v597_v46, %s1102_s18 }
  0xa3   : > { %643 = vrot.lane.b32.xlu0 %v476_v56, %s1103_s19  ;;  %641 = vrot.lane.b32.xlu1 %v452_v60, %s1103_s19 }
  0xa7   : > { %647 = vrot.lane.b32.xlu0 %v524_v61, %s1103_s19  ;;  %645 = vrot.lane.b32.xlu1 %v500_v4, %s1103_s19 }
  0xab   : > { %651 = vrot.lane.b32.xlu0 %v572_v62, %s1103_s19  ;;  %649 = vrot.lane.b32.xlu1 %v548_v7, %s1103_s19 }
  0xaf   : > { %671 = vrot.lane.b32.xlu0 %v430_v8, %s1104_s20  ;;  %653 = vrot.lane.b32.xlu1 %v596_v9, %s1103_s19 }
  0xb3   : > { %675 = vrot.lane.b32.xlu0 %v478_v10, %s1104_s20  ;;  %673 = vrot.lane.b32.xlu1 %v454_v11, %s1104_s20 }
  0xb7   : > { %679 = vrot.lane.b32.xlu0 %v526_v12, %s1104_s20  ;;  %677 = vrot.lane.b32.xlu1 %v502_v15, %s1104_s20 }
  0xbb   : > { %683 = vrot.lane.b32.xlu0 %v574_v16, %s1104_s20  ;;  %681 = vrot.lane.b32.xlu1 %v550_v22, %s1104_s20 }
  0xbf   : > { %390 = vrot.lane.b32.xlu0 %v386_v26, %s1102_s18  ;;  %685 = vrot.lane.b32.xlu1 %v598_v27, %s1104_s20 }
  0xc3   : > { %394 = vrot.lane.b32.xlu1 %v387_v30, %s1103_s19 }
  0xc7   : > { %398 = vrot.lane.b32.xlu1 %v388_v31, %s1104_s20 }
 0x100   : > { %v608_v32 = vpop.permute.xlu0 %607 }
 0x101   : > { %v695_v7 = vsel %vm401_vm0, %v1192_v59, %v608_v32 }
 0x104   : > { %v612_v20 = vpop.permute.xlu0 %611 }
 0x105   : > { %v610_v24 = vpop.permute.xlu1 %609  ;;  %v697_v63 = vsel %vm401_vm0, %v1189_v58, %v612_v20 }
 0x106   : > { %v696_v61 = vsel %vm401_vm0, %v1215_v14, %v610_v24 }
 0x108   : > { %v616_v33 = vpop.permute.xlu0 %615 }
 0x109   : > { %v614_v34 = vpop.permute.xlu1 %613  ;;  %v699_v16 = vsel %vm401_vm0, %v1224_v19, %v616_v33 }
 0x10a   : > { %v698_v14 = vsel %vm401_vm0, %v1212_v13, %v614_v34 }
 0x10d   : > { %v620_v37 = vpop.permute.xlu0 %619  ;;  %v618_v38 = vpop.permute.xlu1 %617 }
 0x10e   : > { %v701_v13 = vsel %vm401_vm0, %v1253_v35, %v620_v37  ;;  %v700_v27 = vsel %vm401_vm0, %v1238_v25, %v618_v38 }
 0x111   : > { %v640_v39 = vpop.permute.xlu0 %639  ;;  %v622_v43 = vpop.permute.xlu1 %621 }
 0x112   : > { %v703_v10 = vsel %vm403_vm1, %v695_v7, %v640_v39  ;;  %v702_v38 = vsel %vm401_vm0, %v1256_v36, %v622_v43 }
 0x115   : > { %v644_v46 = vpop.permute.xlu0 %643  ;;  %v642_v49 = vpop.permute.xlu1 %641 }
 0x116   : > { %v704_v62 = vsel %vm403_vm1, %v696_v61, %v642_v49  ;;  %v705_v5 = vsel %vm403_vm1, %v697_v63, %v644_v46 }
 0x119   : > { %v648_v51 = vpop.permute.xlu0 %647  ;;  %v646_v54 = vpop.permute.xlu1 %645 }
 0x11a   : > { %v706_v11 = vsel %vm403_vm1, %v698_v14, %v646_v54  ;;  %v707_v23 = vsel %vm403_vm1, %v699_v16, %v648_v51 }
 0x11d   : > { %v652_v55 = vpop.permute.xlu0 %651  ;;  %v650_v56 = vpop.permute.xlu1 %649 }
 0x11e   : > { %v709_v28 = vsel %vm403_vm1, %v701_v13, %v652_v55  ;;  %v708_v31 = vsel %vm403_vm1, %v700_v27, %v650_v56 }
 0x121   : > { %v672_v57 = vpop.permute.xlu0 %671  ;;  %v654_v60 = vpop.permute.xlu1 %653 }
 0x122   : > { %v711_v12 = vsel %vm405_vm2, %v703_v10, %v672_v57  ;;  %v862_v10 = vld [vmem:[%s1430_s1 + $0x18] sm:$0xff] }
 0x123   : > { %v722_v19 = vrot.slane %v711_v12, %v1142_v2 }
 0x125   : > { %v676_v50 = vpop.permute.xlu0 %675  ;;  %v674_v4 = vpop.permute.xlu1 %673  ;;  %v751_v39 = vmul.f32 %v722_v19, %v1169_v42 }
 0x126   : > { %v712_v8 = vsel %vm405_vm2, %v704_v62, %v674_v4  ;;  %v713_v9 = vsel %vm405_vm2, %v705_v5, %v676_v50  ;;  %v861_v5 = vld [vmem:[%s1430_s1 + $0x10] sm:$0xff] }
 0x127   : > { %v726_v59 = vrot.slane %v712_v8, %v1142_v2  ;;  %v730_v21 = vrot.slane %v713_v9, %v1142_v2  ;;  %v1105_v9 = vmov 0.0|0.0   ;;  %v1057_v16 = vpack.c.bf16 %v862_v10, %v861_v5 }
 0x128   : > { %1053 = vmatprep.subr.bf16.mxu0 %v1105_v9 }
 0x129   : > { %v680_v58 = vpop.permute.xlu0 %679  ;;  %v678_v15 = vpop.permute.xlu1 %677  ;;  %v752_v24 = vmul.f32 %v726_v59, %v1183_v53  ;;  %v753_v33 = vmul.f32 %v730_v21, %v1167_v41  ;;  %v863_v59 = vld [vmem:[%s1430_s1 + $0x20] sm:$0xff] }
 0x12a   : > { %v714_v22 = vsel %vm405_vm2, %v706_v11, %v678_v15  ;;  %v715_v29 = vsel %vm405_vm2, %v707_v23, %v680_v58  ;;  %v865_v23 = vld [vmem:[%s1430_s1 + $0x30] sm:$0xff] }
 0x12b   : > { %v734_v26 = vrot.slane %v714_v22, %v1142_v2  ;;  %v738_v37 = vrot.slane %v715_v29, %v1142_v2  ;;  %v759_v41 = vcombine.low %v751_v39, %v753_v33 }
 0x12d   : > { %v684_v30 = vpop.permute.xlu0 %683  ;;  %v754_v32 = vmul.f32 %v734_v26, %v1181_v52  ;;  %v682_v20 = vpop.permute.xlu1 %681  ;;  %v710_v52 = vsel %vm403_vm1, %v702_v38, %v654_v60  ;;  %v755_v55 = vmul.f32 %v738_v37, %v1200_v1  ;;  %v766_v60 = vrot.slane %v759_v41, %v1165_v40  ;;  %v866_v26 = vld [vmem:[%s1430_s1 + $0x38] sm:$0xff] }
 0x12e   : > { %v717_v35 = vsel %vm405_vm2, %v709_v28, %v684_v30  ;;  %v716_v25 = vsel %vm405_vm2, %v708_v31, %v682_v20  ;;  %v1063_v29 = vpack.c.bf16 %v866_v26, %v865_v23  ;;  %v867_v31 = vld [vmem:[%s1430_s1 + $0x40] sm:$0xff] }
 0x12f   : > { %v746_v34 = vrot.slane %v717_v35, %v1142_v2  ;;  %v767_v46 = vcombine.low %v752_v24, %v754_v32  ;;  %v742_v49 = vrot.slane %v716_v25, %v1142_v2  ;;  %v868_v32 = vld [vmem:[%s1430_s1 + $0x48] sm:$0xff] }
 0x130   : > { %v1066_v44 = vpack.c.bf16 %v868_v32, %v867_v31 }
 0x131   : > { %v757_v53 = vmul.f32 %v746_v34, %v1221_v18  ;;  %v686_v51 = vpop.permute.xlu1 %685  ;;  %v774_v57 = vrot.slane %v767_v46, %v1165_v40  ;;  %v756_v36 = vmul.f32 %v742_v49, %v1198_v0  ;;  %v859_v0 = vld [vmem:[%s1430_s1] sm:$0xff]  ;;  %v391_v21 = vpop.permute.xlu0 %390 }
 0x132   : > { %v718_v54 = vsel %vm405_vm2, %v710_v52, %v686_v51  ;;  %v402_v28 = vsel %vm401_vm0, %v385_v48, %v391_v21  ;;  %v1013_v46 = vld [vmem:[%s1431_s2] ss:$0 sm:$0xff] }
 0x133   : > { %v750_v56 = vrot.slane %v718_v54, %v1142_v2  ;;  %v775_v42 = vcombine.low %v755_v55, %v757_v53  ;;  %v792_v61 = vcombine.high %v766_v60, %v774_v57  ;;  %v791_v4 = vcombine.low %v766_v60, %v774_v57 }
 0x135   : > { %v758_v43 = vmul.f32 %v750_v56, %v1219_v17  ;;  %v782_v18 = vrot.slane %v775_v42, %v1165_v40  ;;  %v806_v2 = vrot.slane %v792_v61, %v1173_v47  ;;  %v860_v17 = vld [vmem:[%s1430_s1 + $0x8] sm:$0xff]  ;;  %v395_v58 = vpop.permute.xlu1 %394 }
 0x136   : > { %v1054_v14 = vpack.c.bf16 %v860_v17, %v859_v0  ;;  %v404_v19 = vsel %vm403_vm1, %v402_v28, %v395_v58 }
 0x137   : > { %v783_v50 = vcombine.low %v756_v36, %v758_v43 }
 0x138   : > { %1055 = vmatpush3.bf16.msra.mxu0 %v1054_v14 }
 0x139   : > { %v790_v63 = vrot.slane %v783_v50, %v1165_v40  ;;  %v799_v40 = vrot.slane %v791_v4, %v1173_v47  ;;  %1056 = vmatprep.subr.bf16.mxu0 %v1105_v9  ;;  %v399_v27 = vpop.permute.xlu1 %398 }
 0x13a   : > { %v406_v30 = vsel %vm405_vm2, %v404_v19, %v399_v27 }
 0x13b   : > { %v808_v62 = vcombine.high %v782_v18, %v790_v63  ;;  %v807_v1 = vcombine.low %v782_v18, %v790_v63 }
 0x13c   : > { %1058 = vmatpush3.bf16.msra.mxu0 %v1057_v16 }
 0x13d   : > { %v822_v7 = vrot.slane %v808_v62, %v1173_v47  ;;  %v815_v8 = vrot.slane %v807_v1, %v1173_v47  ;;  %v864_v47 = vld [vmem:[%s1430_s1 + $0x28] sm:$0xff]  ;;  %1059 = vmatprep.subr.bf16.mxu0 %v1105_v9 }
 0x13e   : > { %v1060_v13 = vpack.c.bf16 %v864_v47, %v863_v59 }
 0x13f   : > { %v826_v11 = vcombine.high %v806_v2, %v822_v7  ;;  %v824_v12 = vcombine.high %v799_v40, %v815_v8  ;;  %v823_v15 = vcombine.low %v799_v40, %v815_v8  ;;  %v825_v22 = vcombine.low %v806_v2, %v822_v7 }
 0x140   : > { %1061 = vmatpush3.bf16.msra.mxu0 %v1060_v13 }
 0x141   : > { %836 = vrot.lane.b32.xlu1 %v826_v11, %s1106_s6  ;;  %828 = vrot.lane.b32.xlu0 %v824_v12, %s1107_s7 }
 0x142   : > { %1062 = vmatprep.subr.bf16.mxu0 %v1105_v9 }
 0x144   : > { %1064 = vmatpush3.bf16.msra.mxu0 %v1063_v29 }
 0x145   : > { %832 = vrot.lane.b32.xlu0 %v825_v22, %s1108_s15  ;;  %1065 = vmatprep.subr.bf16.mxu0 %v1105_v9 }
 0x148   : > { %1067 = vmatpush3.bf16.msra.mxu0 %v1066_v44 }
 0x149   : > { %846 = vrot.lane.b32.xlu0 %v406_v30, %s1102_s18  ;;  %1048 = vmatprep.subr.mxu0 %v1101_v3  ;;  %s1110_s18 = smov 20  }
 0x14c   : > { %1049 = vmatpush3.msra.mxu0 %v869_v45 }
 0x1b3   : > { %v829_v48 = vpop.permute.xlu0 %828  ;;  %v837_v24 = vpop.permute.xlu1 %836 }
 0x1b4   : > { %v840_v20 = vsel %vm839_vm4, %v823_v15, %v829_v48 }
 0x1b7   : > { %v833_v35 = vpop.permute.xlu0 %832 }
 0x1b8   : > { %v842_v33 = vsel %vm841_vm5, %v840_v20, %v833_v35 }
 0x1b9   : > { %v844_v25 = vsel %vm843_vm6, %v842_v33, %v837_v24 }
 0x1ba   : > { %850 = vrot.lane.b32.xlu1 %v844_v25, %s1110_s18 }
 0x1bb   : > { %v847_v34 = vpop.permute.xlu0 %846 }
 0x1bc   : > { %v853_v37 = vsel %vm401_vm0, %v1149_v6, %v847_v34 }
 0x22c   : > { %v851_v38 = vpop.permute.xlu1 %850 }
 0x22d   : > { %v855_v3 = vsel %vm854_vm7, %v853_v37, %v851_v38 }
 0x22e   : > { %v857_v39 = vsel %vm856_vm8, %v855_v3, 0.0 }
 0x22f   : > { %1051 = vmatmul.mubr.msk.f32.vlgmr.msra.gmra.mrb[0].mxu0 %vm870_vm9, %v857_v39 }
 0x302   : > { %v940_v52 = vpop.f32.mrb[0].mxu0 }
 0x303   : > { %v950_v49 = vadd.f32 %v1013_v46, %v940_v52  ;;  %v1052_v53 = vpop.f32.mrb[1].mxu0 }
 0x305   : > { %951 = vst.msk [vmem:[%s165_s27] sm:$0xff] %vm403_vm1, %v950_v49 }
 0x306 PF: > { %s13_s12 = sadd.s32 1, %s1096_s12  }
 0x307   : > { %p10_p4 = scmp.ge.s32.totalorder %s13_s12, 4  }
 0x309   :  { %12 = sbr.rel (!%p10_p4) target bundleno = 1 (0x1), region = 62 }

// kernel: tpu_custom_call.1
= control target key start
LH: loop header
LB: loop body
LE: loop exit
PB: predicated region body
PF: predicated region fallthrough
CT: control target
= control target key end

     0   :  { %s1131_s12 = smov 0   ;;  %s1429_s0 = inlined_call_operand.vmem [shape: f32[16,4], index: 0, kind: input, shape index: {}]   ;;  %s1430_s1 = inlined_call_operand.vmem [shape: f32[88,8], index: 1, kind: input, shape index: {}]   ;;  %s1431_s2 = inlined_call_operand.vmem [shape: f32[1,8], index: 2, kind: input, shape index: {}]   ;;  %s1432_s3 = inlined_call_operand.vmem [shape: f32[16,8], index: 3, kind: output, shape index: {}]  }
   0x1 LB: > { %s1005_s13 = sadd.s32 4294967295, %s1096_s12   ;;  %p1009_p0 = scmp.ge.s32.totalorder %s1096_s12, 1  ;;  %s1096_s12 = sphi %s1131_s12, %s13_s12  }
   0x2   : > { %p136_p1 = scmp.lt.s32.totalorder %s1096_s12, 3 }
   0x4   : > { %p137_p2 = pnand %p1009_p0, %p136_p1 }
   0x5   : > { %p158_p3 = scmp.lt.s32.totalorder (!%p137_p2), %s1005_s13, 1  ;;  %v167_v0 = vlaneseq (!%p137_p2)  ;;  %v1098_v19 = vmov (!%p137_p2), 1966171168   ;;  %v1099_v27 = vmov (!%p137_p2), 1983009808   ;;  %s1102_s18 = smov (!%p137_p2), 4  }
   0x6   : > { %140 = sbr.rel (%p137_p2) target bundleno = 774 (0x306), region = 32  ;;  %v226_v20 = vunpack.c.l.s4 (!%p137_p2), %v1098_v19  ;;  %v323_v28 = vunpack.c.l.s4 (!%p137_p2), %v1099_v27  ;;  %v1100_v31 = vmov (!%p137_p2), 1934713408   ;;  %s1103_s19 = smov (!%p137_p2), 8   ;;  %vm401_vm0 = vcmask (!%p137_p2), 31744  }
   0x7   : > { %v168_v1 = vshrl.u32 (!%p137_p2), %v167_v0, 7  ;;  %v356_v32 = vunpack.c.l.s4 (!%p137_p2), %v1100_v31  ;;  %s1104_s20 = smov (!%p137_p2), 12   ;;  %vm403_vm1 = vcmask (!%p137_p2), 64512   ;;  %vm405_vm2 = vcmask (!%p137_p2), 97280   ;;  %s1106_s6 = smov (!%p137_p2), 48  }
   0x8   : > { %v227_v21 = vunpack.c.0.s8 (!%p137_p2), %v226_v20  ;;  %v324_v34 = vunpack.c.0.s8 (!%p137_p2), %v323_v28  ;;  %s1107_s7 = smov (!%p137_p2), 16   ;;  %s1108_s15 = smov (!%p137_p2), 32   ;;  %vm1109_vm3 = vmmov (!%p137_p2), 0   ;;  %vm839_vm4 = vcmask (!%p137_p2), 130048  }
   0x9   : > { %v1142_v2 = vsub.s32 (!%p137_p2), 0, %v168_v1  ;;  %v183_v3 = vsub.s32 (!%p137_p2), 2, %v168_v1  ;;  %v190_v4 = vsub.s32 (!%p137_p2), 3, %v168_v1  ;;  %v176_v5 = vsub.s32 (!%p137_p2), 1, %v168_v1 }
   0xa   : > { %v204_v11 = vsub.s32 (!%p137_p2), 5, %v168_v1  ;;  %v197_v12 = vsub.s32 (!%p137_p2), 4, %v168_v1  ;;  %v218_v15 = vsub.s32 (!%p137_p2), 7, %v168_v1  ;;  %v211_v16 = vsub.s32 (!%p137_p2), 6, %v168_v1 }
   0xb   : > { %v230_v22 = vsub.s32 (!%p137_p2), %v227_v21, %v168_v1  ;;  %v357_v38 = vunpack.c.0.s8 (!%p137_p2), %v356_v32  ;;  %v1165_v40 = vsub.s32 (!%p137_p2), %v324_v34, %v168_v1  ;;  %vm841_vm5 = vcmask (!%p137_p2), 261120  }
   0xc   : > { %vm843_vm6 = vcmask (!%p137_p2), 392192   ;;  %vm854_vm7 = vcmask (!%p137_p2), 162816   ;;  %vm856_vm8 = vcmask (!%p137_p2), 687104   ;;  %vm870_vm9 = vcmask (!%p137_p2), 719872  }
   0xd   : > { %s1434_s13 = smov (!%p158_p3, %s1005_s13), 1  ;;  %v1173_v47 = vsub.s32 %v357_v38, %v168_v1 }
   0xe   : > { %s1010_s14 = sshll.u32 %s1434_s13, 3 }
   0xf   : > { %s161_s17 = scalar_lea.vmem %s1429_s0, %s1010_s14  ;;  %s165_s27 = scalar_lea.vmem %s1432_s3, %s1010_s14 }
  0x10   : > { %v1149_v6 = vld [vmem:[%s161_s17] sm:$0xff] }
  0x11   : > { %v184_v7 = vrot.slane %v1149_v6, %v183_v3  ;;  %v170_v8 = vrot.slane %v1149_v6, %v1142_v2  ;;  %v191_v9 = vrot.slane %v1149_v6, %v190_v4  ;;  %v177_v10 = vrot.slane %v1149_v6, %v176_v5 }
  0x12   : > { %v205_v13 = vrot.slane %v1149_v6, %v204_v11  ;;  %v198_v14 = vrot.slane %v1149_v6, %v197_v12  ;;  %v219_v17 = vrot.slane %v1149_v6, %v218_v15  ;;  %v212_v18 = vrot.slane %v1149_v6, %v211_v16 }
  0x13   : > { %186 = vbcast.lane.b32.xlu1 %v184_v7, 256  ;;  %172 = vbcast.lane.b32.xlu0 %v170_v8, 256  ;;  %v231_v23 = vrot.slane %v1149_v6, %v230_v22  ;;  %v224_v25 = vcombine.high %v1149_v6, %v1149_v6  ;;  %v1101_v3 = vmov 0.0  }
  0x14   : > { %1050 = vmatprep.mubr.msk.f32.mxu0 %vm1109_vm3, %v1101_v3 }
  0x15   : > { %v247_v24 = vrot.slane %v231_v23, %v230_v22  ;;  %v239_v26 = vcombine.high %v231_v23, %v231_v23  ;;  %v238_v30 = vrot.slane %v224_v25, %v230_v22 }
  0x17   : > { %193 = vbcast.lane.b32.xlu1 %v191_v9, 256  ;;  %179 = vbcast.lane.b32.xlu0 %v177_v10, 256  ;;  %v269_v29 = vcombine.high %v247_v24, %v247_v24  ;;  %v261_v33 = vrot.slane %v239_v26, %v230_v22  ;;  %v276_v36 = vrot.slane %v247_v24, %v1142_v2 }
  0x18   : > { %v240_v37 = vcombine.high %v238_v30, %v238_v30  ;;  %v254_v46 = vrot.slane %v238_v30, %v230_v22 }
  0x19   : > { %v284_v35 = vrot.slane %v269_v29, %v1142_v2  ;;  %v271_v39 = vcombine.high %v261_v33, %v261_v33  ;;  %v280_v49 = vrot.slane %v261_v33, %v1142_v2 }
  0x1a   : > { %v268_v45 = vrot.slane %v240_v37, %v230_v22  ;;  %v292_v55 = vrot.slane %v254_v46, %v1142_v2  ;;  %v270_v57 = vcombine.high %v254_v46, %v254_v46 }
  0x1b   : > { %207 = vbcast.lane.b32.xlu1 %v205_v13, 256  ;;  %200 = vbcast.lane.b32.xlu0 %v198_v14, 256  ;;  %v288_v48 = vrot.slane %v271_v39, %v1142_v2 }
  0x1c   : > { %v296_v54 = vrot.slane %v268_v45, %v1142_v2  ;;  %v272_v56 = vcombine.high %v268_v45, %v268_v45  ;;  %v300_v8 = vrot.slane %v270_v57, %v1142_v2 }
  0x1e   : > { %v304_v11 = vrot.slane %v272_v56, %v1142_v2 }
  0x1f   : > { %221 = vbcast.lane.b32.xlu1 %v219_v17, 256  ;;  %214 = vbcast.lane.b32.xlu0 %v212_v18, 256 }
  0x85   : > { %v1167_v41 = vpop.permute.xlu1 %186  ;;  %v1169_v42 = vpop.permute.xlu0 %172 }
  0x86   : > { %v315_v43 = vmul.f32 %v284_v35, %v1167_v41  ;;  %v313_v44 = vmul.f32 %v276_v36, %v1169_v42 }
  0x88   : > { %v1178_v50 = vrot.slane %v315_v43, %v1165_v40  ;;  %v413_v51 = vrot.slane %v313_v44, %v1165_v40  ;;  %v321_v9 = vcombine.low %v313_v44, %v315_v43 }
  0x89   : > { %v1181_v52 = vpop.permute.xlu1 %193  ;;  %v1183_v53 = vpop.permute.xlu0 %179 }
  0x8a   : > { %v1189_v58 = vrot.slane %v1178_v50, %v1173_v47  ;;  %v1192_v59 = vrot.slane %v413_v51, %v1173_v47  ;;  %v316_v60 = vmul.f32 %v288_v48, %v1181_v52  ;;  %v314_v61 = vmul.f32 %v280_v49, %v1183_v53 }
  0x8b   : > { %v1235_v24 = vrot.slane %v321_v9, %v1165_v40  ;;  %v414_v39 = vcombine.high %v413_v51, %v1101_v3  ;;  %v462_v49 = vcombine.high %v1178_v50, %v1101_v3 }
  0x8c   : > { %v485_v62 = vrot.slane %v316_v60, %v1165_v40  ;;  %v437_v63 = vrot.slane %v314_v61, %v1165_v40  ;;  %v429_v4 = vcombine.high %v1192_v59, %v1101_v3  ;;  %v329_v10 = vcombine.low %v314_v61, %v316_v60 }
  0x8d   : > { %v1198_v0 = vpop.permute.xlu1 %207  ;;  %v1200_v1 = vpop.permute.xlu0 %200  ;;  %v477_v12 = vcombine.high %v1189_v58, %v1101_v3  ;;  %v428_v51 = vrot.slane %v414_v39, %v1173_v47  ;;  %v476_v56 = vrot.slane %v462_v49, %v1173_v47 }
  0x8e   : > { %v318_v5 = vmul.f32 %v296_v54, %v1198_v0  ;;  %v317_v7 = vmul.f32 %v292_v55, %v1200_v1  ;;  %607 = vrot.lane.b32.xlu0 %v429_v4, %s1102_s18  ;;  %v1212_v13 = vrot.slane %v485_v62, %v1173_v47  ;;  %v1215_v14 = vrot.slane %v437_v63, %v1173_v47 }
  0x8f   : > { %v1227_v20 = vrot.slane %v329_v10, %v1165_v40  ;;  %v438_v54 = vcombine.high %v437_v63, %v1101_v3  ;;  %v486_v57 = vcombine.high %v485_v62, %v1101_v3  ;;  %v478_v10 = vcombine.high %v476_v56, %v1101_v3 }
  0x90   : > { %v533_v15 = vrot.slane %v318_v5, %v1165_v40  ;;  %v509_v16 = vrot.slane %v317_v7, %v1165_v40  ;;  %v453_v23 = vcombine.high %v1215_v14, %v1101_v3  ;;  %v501_v26 = vcombine.high %v1212_v13, %v1101_v3 }
  0x91   : > { %v1219_v17 = vpop.permute.xlu1 %221  ;;  %v1221_v18 = vpop.permute.xlu0 %214  ;;  %v353_v32 = vcombine.low %v1235_v24, %v1227_v20  ;;  %v452_v60 = vrot.slane %v438_v54, %v1173_v47  ;;  %v500_v4 = vrot.slane %v486_v57, %v1173_v47 }
  0x92   : > { %v1224_v19 = vrot.slane %v509_v16, %v1173_v47  ;;  %v320_v21 = vmul.f32 %v304_v11, %v1219_v17  ;;  %v319_v22 = vmul.f32 %v300_v8, %v1221_v18  ;;  %611 = vrot.lane.b32.xlu0 %v477_v12, %s1102_s18  ;;  %v1238_v25 = vrot.slane %v533_v15, %v1173_v47 }
  0x93   : > { %609 = vrot.lane.b32.xlu1 %v453_v23, %s1102_s18  ;;  %v1265_v44 = vrot.slane %v353_v32, %v1173_v47  ;;  %v510_v55 = vcombine.high %v509_v16, %v1101_v3  ;;  %v534_v63 = vcombine.high %v533_v15, %v1101_v3  ;;  %v430_v8 = vcombine.high %v428_v51, %v1101_v3 }
  0x94   : > { %v525_v27 = vcombine.high %v1224_v19, %v1101_v3  ;;  %v345_v28 = vcombine.low %v318_v5, %v320_v21  ;;  %v581_v29 = vrot.slane %v320_v21, %v1165_v40  ;;  %v337_v30 = vcombine.low %v317_v7, %v319_v22 }
  0x95   : > { %v557_v31 = vrot.slane %v319_v22, %v1165_v40  ;;  %v549_v38 = vcombine.high %v1238_v25, %v1101_v3  ;;  %v524_v61 = vrot.slane %v510_v55, %v1173_v47  ;;  %v548_v7 = vrot.slane %v534_v63, %v1173_v47 }
  0x96   : > { %v352_v33 = vrot.slane %v345_v28, %v1165_v40  ;;  %v344_v34 = vrot.slane %v337_v30, %v1165_v40  ;;  %615 = vrot.lane.b32.xlu0 %v525_v27, %s1102_s18  ;;  %v1256_v36 = vrot.slane %v581_v29, %v1173_v47  ;;  %v582_v5 = vcombine.high %v581_v29, %v1101_v3 }
  0x97   : > { %v1253_v35 = vrot.slane %v557_v31, %v1173_v47  ;;  %613 = vrot.lane.b32.xlu1 %v501_v26, %s1102_s18  ;;  %v558_v50 = vcombine.high %v557_v31, %v1101_v3  ;;  %v454_v11 = vcombine.high %v452_v60, %v1101_v3  ;;  %v526_v12 = vcombine.high %v524_v61, %v1101_v3 }
  0x98   : > { %v369_v37 = vcombine.low %v344_v34, %v352_v33  ;;  %v597_v46 = vcombine.high %v1256_v36, %v1101_v3  ;;  %v596_v9 = vrot.slane %v582_v5, %v1173_v47  ;;  %v502_v15 = vcombine.high %v500_v4, %v1101_v3 }
  0x99   : > { %v573_v43 = vcombine.high %v1253_v35, %v1101_v3  ;;  %v572_v62 = vrot.slane %v558_v50, %v1173_v47  ;;  %v370_v21 = vcombine.high %v344_v34, %v352_v33  ;;  %v550_v22 = vcombine.high %v548_v7, %v1101_v3 }
  0x9a   : > { %v1268_v45 = vrot.slane %v369_v37, %v1173_v47  ;;  %v354_v23 = vcombine.high %v1235_v24, %v1227_v20  ;;  %v598_v27 = vcombine.high %v596_v9, %v1101_v3 }
  0x9b   : > { %619 = vrot.lane.b32.xlu0 %v573_v43, %s1102_s18  ;;  %617 = vrot.lane.b32.xlu1 %v549_v38, %s1102_s18  ;;  %v574_v16 = vcombine.high %v572_v62, %v1101_v3  ;;  %v384_v28 = vrot.slane %v370_v21, %v1173_v47 }
  0x9c   : > { %v385_v48 = vcombine.low %v1265_v44, %v1268_v45  ;;  %v386_v26 = vcombine.high %v1265_v44, %v1268_v45  ;;  %v368_v29 = vrot.slane %v354_v23, %v1173_v47  ;;  %v869_v45 = vld [vmem:[%s1430_s1 + $0x50] sm:$0xff] }
  0x9e   : > { %v387_v30 = vcombine.low %v368_v29, %v384_v28  ;;  %v388_v31 = vcombine.high %v368_v29, %v384_v28 }
  0x9f   : > { %639 = vrot.lane.b32.xlu0 %v428_v51, %s1103_s19  ;;  %621 = vrot.lane.b32.xlu1 %v597_v46, %s1102_s18 }
  0xa3   : > { %643 = vrot.lane.b32.xlu0 %v476_v56, %s1103_s19  ;;  %641 = vrot.lane.b32.xlu1 %v452_v60, %s1103_s19 }
  0xa7   : > { %647 = vrot.lane.b32.xlu0 %v524_v61, %s1103_s19  ;;  %645 = vrot.lane.b32.xlu1 %v500_v4, %s1103_s19 }
  0xab   : > { %651 = vrot.lane.b32.xlu0 %v572_v62, %s1103_s19  ;;  %649 = vrot.lane.b32.xlu1 %v548_v7, %s1103_s19 }
  0xaf   : > { %671 = vrot.lane.b32.xlu0 %v430_v8, %s1104_s20  ;;  %653 = vrot.lane.b32.xlu1 %v596_v9, %s1103_s19 }
  0xb3   : > { %675 = vrot.lane.b32.xlu0 %v478_v10, %s1104_s20  ;;  %673 = vrot.lane.b32.xlu1 %v454_v11, %s1104_s20 }
  0xb7   : > { %679 = vrot.lane.b32.xlu0 %v526_v12, %s1104_s20  ;;  %677 = vrot.lane.b32.xlu1 %v502_v15, %s1104_s20 }
  0xbb   : > { %683 = vrot.lane.b32.xlu0 %v574_v16, %s1104_s20  ;;  %681 = vrot.lane.b32.xlu1 %v550_v22, %s1104_s20 }
  0xbf   : > { %390 = vrot.lane.b32.xlu0 %v386_v26, %s1102_s18  ;;  %685 = vrot.lane.b32.xlu1 %v598_v27, %s1104_s20 }
  0xc3   : > { %394 = vrot.lane.b32.xlu1 %v387_v30, %s1103_s19 }
  0xc7   : > { %398 = vrot.lane.b32.xlu1 %v388_v31, %s1104_s20 }
 0x100   : > { %v608_v32 = vpop.permute.xlu0 %607 }
 0x101   : > { %v695_v7 = vsel %vm401_vm0, %v1192_v59, %v608_v32 }
 0x104   : > { %v612_v20 = vpop.permute.xlu0 %611 }
 0x105   : > { %v610_v24 = vpop.permute.xlu1 %609  ;;  %v697_v63 = vsel %vm401_vm0, %v1189_v58, %v612_v20 }
 0x106   : > { %v696_v61 = vsel %vm401_vm0, %v1215_v14, %v610_v24 }
 0x108   : > { %v616_v33 = vpop.permute.xlu0 %615 }
 0x109   : > { %v614_v34 = vpop.permute.xlu1 %613  ;;  %v699_v16 = vsel %vm401_vm0, %v1224_v19, %v616_v33 }
 0x10a   : > { %v698_v14 = vsel %vm401_vm0, %v1212_v13, %v614_v34 }
 0x10d   : > { %v620_v37 = vpop.permute.xlu0 %619  ;;  %v618_v38 = vpop.permute.xlu1 %617 }
 0x10e   : > { %v701_v13 = vsel %vm401_vm0, %v1253_v35, %v620_v37  ;;  %v700_v27 = vsel %vm401_vm0, %v1238_v25, %v618_v38 }
 0x111   : > { %v640_v39 = vpop.permute.xlu0 %639  ;;  %v622_v43 = vpop.permute.xlu1 %621 }
 0x112   : > { %v703_v10 = vsel %vm403_vm1, %v695_v7, %v640_v39  ;;  %v702_v38 = vsel %vm401_vm0, %v1256_v36, %v622_v43 }
 0x115   : > { %v644_v46 = vpop.permute.xlu0 %643  ;;  %v642_v49 = vpop.permute.xlu1 %641 }
 0x116   : > { %v704_v62 = vsel %vm403_vm1, %v696_v61, %v642_v49  ;;  %v705_v5 = vsel %vm403_vm1, %v697_v63, %v644_v46 }
 0x119   : > { %v648_v51 = vpop.permute.xlu0 %647  ;;  %v646_v54 = vpop.permute.xlu1 %645 }
 0x11a   : > { %v706_v11 = vsel %vm403_vm1, %v698_v14, %v646_v54  ;;  %v707_v23 = vsel %vm403_vm1, %v699_v16, %v648_v51 }
 0x11d   : > { %v652_v55 = vpop.permute.xlu0 %651  ;;  %v650_v56 = vpop.permute.xlu1 %649 }
 0x11e   : > { %v709_v28 = vsel %vm403_vm1, %v701_v13, %v652_v55  ;;  %v708_v31 = vsel %vm403_vm1, %v700_v27, %v650_v56 }
 0x121   : > { %v672_v57 = vpop.permute.xlu0 %671  ;;  %v654_v60 = vpop.permute.xlu1 %653 }
 0x122   : > { %v711_v12 = vsel %vm405_vm2, %v703_v10, %v672_v57  ;;  %v862_v10 = vld [vmem:[%s1430_s1 + $0x18] sm:$0xff] }
 0x123   : > { %v722_v19 = vrot.slane %v711_v12, %v1142_v2 }
 0x125   : > { %v676_v50 = vpop.permute.xlu0 %675  ;;  %v674_v4 = vpop.permute.xlu1 %673  ;;  %v751_v39 = vmul.f32 %v722_v19, %v1169_v42 }
 0x126   : > { %v712_v8 = vsel %vm405_vm2, %v704_v62, %v674_v4  ;;  %v713_v9 = vsel %vm405_vm2, %v705_v5, %v676_v50  ;;  %v861_v5 = vld [vmem:[%s1430_s1 + $0x10] sm:$0xff] }
 0x127   : > { %v726_v59 = vrot.slane %v712_v8, %v1142_v2  ;;  %v730_v21 = vrot.slane %v713_v9, %v1142_v2  ;;  %v1105_v9 = vmov 0.0|0.0   ;;  %v1057_v16 = vpack.c.bf16 %v862_v10, %v861_v5 }
 0x128   : > { %1053 = vmatprep.subr.bf16.mxu0 %v1105_v9 }
 0x129   : > { %v680_v58 = vpop.permute.xlu0 %679  ;;  %v678_v15 = vpop.permute.xlu1 %677  ;;  %v752_v24 = vmul.f32 %v726_v59, %v1183_v53  ;;  %v753_v33 = vmul.f32 %v730_v21, %v1167_v41  ;;  %v863_v59 = vld [vmem:[%s1430_s1 + $0x20] sm:$0xff] }
 0x12a   : > { %v714_v22 = vsel %vm405_vm2, %v706_v11, %v678_v15  ;;  %v715_v29 = vsel %vm405_vm2, %v707_v23, %v680_v58  ;;  %v865_v23 = vld [vmem:[%s1430_s1 + $0x30] sm:$0xff] }
 0x12b   : > { %v734_v26 = vrot.slane %v714_v22, %v1142_v2  ;;  %v738_v37 = vrot.slane %v715_v29, %v1142_v2  ;;  %v759_v41 = vcombine.low %v751_v39, %v753_v33 }
 0x12d   : > { %v684_v30 = vpop.permute.xlu0 %683  ;;  %v754_v32 = vmul.f32 %v734_v26, %v1181_v52  ;;  %v682_v20 = vpop.permute.xlu1 %681  ;;  %v710_v52 = vsel %vm403_vm1, %v702_v38, %v654_v60  ;;  %v755_v55 = vmul.f32 %v738_v37, %v1200_v1  ;;  %v766_v60 = vrot.slane %v759_v41, %v1165_v40  ;;  %v866_v26 = vld [vmem:[%s1430_s1 + $0x38] sm:$0xff] }
 0x12e   : > { %v717_v35 = vsel %vm405_vm2, %v709_v28, %v684_v30  ;;  %v716_v25 = vsel %vm405_vm2, %v708_v31, %v682_v20  ;;  %v1063_v29 = vpack.c.bf16 %v866_v26, %v865_v23  ;;  %v867_v31 = vld [vmem:[%s1430_s1 + $0x40] sm:$0xff] }
 0x12f   : > { %v746_v34 = vrot.slane %v717_v35, %v1142_v2  ;;  %v767_v46 = vcombine.low %v752_v24, %v754_v32  ;;  %v742_v49 = vrot.slane %v716_v25, %v1142_v2  ;;  %v868_v32 = vld [vmem:[%s1430_s1 + $0x48] sm:$0xff] }
 0x130   : > { %v1066_v44 = vpack.c.bf16 %v868_v32, %v867_v31 }
 0x131   : > { %v757_v53 = vmul.f32 %v746_v34, %v1221_v18  ;;  %v686_v51 = vpop.permute.xlu1 %685  ;;  %v774_v57 = vrot.slane %v767_v46, %v1165_v40  ;;  %v756_v36 = vmul.f32 %v742_v49, %v1198_v0  ;;  %v859_v0 = vld [vmem:[%s1430_s1] sm:$0xff]  ;;  %v391_v21 = vpop.permute.xlu0 %390 }
 0x132   : > { %v718_v54 = vsel %vm405_vm2, %v710_v52, %v686_v51  ;;  %v402_v28 = vsel %vm401_vm0, %v385_v48, %v391_v21  ;;  %v1013_v46 = vld [vmem:[%s1431_s2] ss:$0 sm:$0xff] }
 0x133   : > { %v750_v56 = vrot.slane %v718_v54, %v1142_v2  ;;  %v775_v42 = vcombine.low %v755_v55, %v757_v53  ;;  %v792_v61 = vcombine.high %v766_v60, %v774_v57  ;;  %v791_v4 = vcombine.low %v766_v60, %v774_v57 }
 0x135   : > { %v758_v43 = vmul.f32 %v750_v56, %v1219_v17  ;;  %v782_v18 = vrot.slane %v775_v42, %v1165_v40  ;;  %v806_v2 = vrot.slane %v792_v61, %v1173_v47  ;;  %v860_v17 = vld [vmem:[%s1430_s1 + $0x8] sm:$0xff]  ;;  %v395_v58 = vpop.permute.xlu1 %394 }
 0x136   : > { %v1054_v14 = vpack.c.bf16 %v860_v17, %v859_v0  ;;  %v404_v19 = vsel %vm403_vm1, %v402_v28, %v395_v58 }
 0x137   : > { %v783_v50 = vcombine.low %v756_v36, %v758_v43 }
 0x138   : > { %1055 = vmatpush3.bf16.msra.mxu0 %v1054_v14 }
 0x139   : > { %v790_v63 = vrot.slane %v783_v50, %v1165_v40  ;;  %v799_v40 = vrot.slane %v791_v4, %v1173_v47  ;;  %1056 = vmatprep.subr.bf16.mxu0 %v1105_v9  ;;  %v399_v27 = vpop.permute.xlu1 %398 }
 0x13a   : > { %v406_v30 = vsel %vm405_vm2, %v404_v19, %v399_v27 }
 0x13b   : > { %v808_v62 = vcombine.high %v782_v18, %v790_v63  ;;  %v807_v1 = vcombine.low %v782_v18, %v790_v63 }
 0x13c   : > { %1058 = vmatpush3.bf16.msra.mxu0 %v1057_v16 }
 0x13d   : > { %v822_v7 = vrot.slane %v808_v62, %v1173_v47  ;;  %v815_v8 = vrot.slane %v807_v1, %v1173_v47  ;;  %v864_v47 = vld [vmem:[%s1430_s1 + $0x28] sm:$0xff]  ;;  %1059 = vmatprep.subr.bf16.mxu0 %v1105_v9 }
 0x13e   : > { %v1060_v13 = vpack.c.bf16 %v864_v47, %v863_v59 }
 0x13f   : > { %v826_v11 = vcombine.high %v806_v2, %v822_v7  ;;  %v824_v12 = vcombine.high %v799_v40, %v815_v8  ;;  %v823_v15 = vcombine.low %v799_v40, %v815_v8  ;;  %v825_v22 = vcombine.low %v806_v2, %v822_v7 }
 0x140   : > { %1061 = vmatpush3.bf16.msra.mxu0 %v1060_v13 }
 0x141   : > { %836 = vrot.lane.b32.xlu1 %v826_v11, %s1106_s6  ;;  %828 = vrot.lane.b32.xlu0 %v824_v12, %s1107_s7 }
 0x142   : > { %1062 = vmatprep.subr.bf16.mxu0 %v1105_v9 }
 0x144   : > { %1064 = vmatpush3.bf16.msra.mxu0 %v1063_v29 }
 0x145   : > { %832 = vrot.lane.b32.xlu0 %v825_v22, %s1108_s15  ;;  %1065 = vmatprep.subr.bf16.mxu0 %v1105_v9 }
 0x148   : > { %1067 = vmatpush3.bf16.msra.mxu0 %v1066_v44 }
 0x149   : > { %846 = vrot.lane.b32.xlu0 %v406_v30, %s1102_s18  ;;  %1048 = vmatprep.subr.mxu0 %v1101_v3  ;;  %s1110_s18 = smov 20  }
 0x14c   : > { %1049 = vmatpush3.msra.mxu0 %v869_v45 }
 0x1b3   : > { %v829_v48 = vpop.permute.xlu0 %828  ;;  %v837_v24 = vpop.permute.xlu1 %836 }
 0x1b4   : > { %v840_v20 = vsel %vm839_vm4, %v823_v15, %v829_v48 }
 0x1b7   : > { %v833_v35 = vpop.permute.xlu0 %832 }
 0x1b8   : > { %v842_v33 = vsel %vm841_vm5, %v840_v20, %v833_v35 }
 0x1b9   : > { %v844_v25 = vsel %vm843_vm6, %v842_v33, %v837_v24 }
 0x1ba   : > { %850 = vrot.lane.b32.xlu1 %v844_v25, %s1110_s18 }
 0x1bb   : > { %v847_v34 = vpop.permute.xlu0 %846 }
 0x1bc   : > { %v853_v37 = vsel %vm401_vm0, %v1149_v6, %v847_v34 }
 0x22c   : > { %v851_v38 = vpop.permute.xlu1 %850 }
 0x22d   : > { %v855_v3 = vsel %vm854_vm7, %v853_v37, %v851_v38 }
 0x22e   : > { %v857_v39 = vsel %vm856_vm8, %v855_v3, 0.0 }
 0x22f   : > { %1051 = vmatmul.mubr.msk.f32.vlgmr.msra.gmra.mrb[0].mxu0 %vm870_vm9, %v857_v39 }
 0x302   : > { %v940_v52 = vpop.f32.mrb[0].mxu0 }
 0x303   : > { %v950_v49 = vadd.f32 %v1013_v46, %v940_v52  ;;  %v1052_v53 = vpop.f32.mrb[1].mxu0 }
 0x305   : > { %951 = vst.msk [vmem:[%s165_s27] sm:$0xff] %vm403_vm1, %v950_v49 }
 0x306 PF: > { %s13_s12 = sadd.s32 1, %s1096_s12  }
 0x307   : > { %p10_p4 = scmp.ge.s32.totalorder %s13_s12, 4  }
 0x309   :  { %12 = sbr.rel (!%p10_p4) target bundleno = 1 (0x1), region = 62 }

</bundles_post_ra>
